<compile_context>
chip_gen: v7x
topology: tpu7x:2x2x1
jax: 0.10.0
libtpu: 0.0.40
codegen_flags: <defaults>
</compile_context>

<pallas_src>
import functools

import jax
import jax.numpy as jnp
from jax.experimental import pallas as pl
from jax.experimental.pallas import tpu as pltpu


def _round_up(x, m):
    return ((x + m - 1) // m) * m


def _pick_tile_rows(n_rows, d, itemsize, max_tile_rows):
    """Largest row-tile that keeps 3 double-buffered input streams in VMEM."""
    budget = 20 * 1024 * 1024           # headroom under the 32 MiB scoped limit
    per_row = 3 * 2 * d * itemsize       # 3 inputs x 2 pipeline buffers
    tn = budget // max(per_row, 1)
    tn = min(tn, max_tile_rows, _round_up(n_rows, 16))
    tn = max(16, (tn // 16) * 16)        # multiple of 16: fine for f32 and bf16
    return int(tn)


def _margin_loss_kernel(beta_ref, a_ref, p_ref, n_ref, part_ref,
                        sum_sc, cnt_sc, *, margin, tile_n, n_rows,
                        tiles_per_shard, needs_mask):
    s = pl.program_id(0)                 # shard  (parallel axis)
    t = pl.program_id(1)                 # tile within shard (reduction axis)

    @pl.when(t == 0)
    def _init():
        sum_sc[0, 0] = jnp.float32(0.0)
        cnt_sc[0, 0] = jnp.float32(0.0)

    beta = beta_ref[0, 0]

    # Upcast is a no-op for f32 inputs; meaningful (and free under the DMA)
    # if the embeddings are streamed as bf16 to halve HBM traffic.
    a = a_ref[...].astype(jnp.float32)
    p = p_ref[...].astype(jnp.float32)
    n = n_ref[...].astype(jnp.float32)

    # Per-row L2 distances over the feature axis (torch dim=1).
    d_ap = jnp.sqrt(jnp.sum((p - a) ** 2, axis=1, keepdims=True) + 1e-08)  # (TN,1)
    d_an = jnp.sqrt(jnp.sum((n - a) ** 2, axis=1, keepdims=True) + 1e-08)  # (TN,1)

    pos_loss = jnp.maximum(d_ap - beta + margin, 0.0)
    neg_loss = jnp.maximum(beta - d_an + margin, 0.0)
    hinge = pos_loss + neg_loss
    # torch: (pos_loss > 0) + (neg_loss > 0) on bools == logical OR.
    active = jnp.logical_or(pos_loss > 0.0, neg_loss > 0.0).astype(jnp.float32)

    if needs_mask:
        # Mask rows beyond N in the (padded) edge tile; padded rows would
        # otherwise contribute ~(beta + margin) and inflate the pair count.
        block = s * tiles_per_shard + t
        row = block * tile_n + jax.lax.broadcasted_iota(jnp.int32, (tile_n, 1), 0)
        valid = row < n_rows
        hinge = jnp.where(valid, hinge, 0.0)
        active = jnp.where(valid, active, 0.0)

    sum_sc[0, 0] += jnp.sum(hinge)
    cnt_sc[0, 0] += jnp.sum(active)

    @pl.when(t == pl.num_programs(1) - 1)
    def _finalize():
        # Write this shard's partials into a lane-dense (1, 8, 128) block:
        # [0,0,0] = loss sum, [0,0,1] = active-pair count, rest zero.
        sub = jax.lax.broadcasted_iota(jnp.int32, (1, 8, 128), 1)
        lane = jax.lax.broadcasted_iota(jnp.int32, (1, 8, 128), 2)
        vals = jnp.where((sub == 0) & (lane == 0), sum_sc[0, 0],
               jnp.where((sub == 0) & (lane == 1), cnt_sc[0, 0],
                         jnp.float32(0.0)))
        part_ref[...] = vals


def margin_loss(anchors, positives, negatives, beta, *, margin=0.2,
                max_tile_rows=4096):
    """Pallas implementation of MarginLoss.forward.

    Returns (loss, pair_cnt) as (scalar f32, scalar i32)."""
    N, D = anchors.shape
    itemsize = jnp.dtype(anchors.dtype).itemsize

    tile_n = _pick_tile_rows(N, D, itemsize, max_tile_rows)
    num_tiles = pl.cdiv(N, tile_n)
    # Shard the reduction across the 2 TensorCores on v7x when it splits
    # evenly; on single-TC chips the "parallel" axis just runs serially.
    num_shards = 2 if (num_tiles >= 2 and num_tiles % 2 == 0) else 1
    tiles_per_shard = num_tiles // num_shards
    needs_mask = (num_tiles * tile_n != N)

    beta_arr = jnp.asarray(beta, jnp.float32).reshape(1, 1)

    kernel = functools.partial(
        _margin_loss_kernel,
        margin=float(margin), tile_n=tile_n, n_rows=N,
        tiles_per_shard=tiles_per_shard, needs_mask=needs_mask)

    row_block = lambda s, t: (s * tiles_per_shard + t, 0)

    partials = pl.pallas_call(
        kernel,
        out_shape=jax.ShapeDtypeStruct((num_shards, 8, 128), jnp.float32),
        grid_spec=pltpu.PrefetchScalarGridSpec(
            num_scalar_prefetch=0,
            grid=(num_shards, tiles_per_shard),
            in_specs=[
                pl.BlockSpec(memory_space=pltpu.SMEM),          # beta (scalar)
                pl.BlockSpec((tile_n, D), row_block),            # anchors
                pl.BlockSpec((tile_n, D), row_block),            # positives
                pl.BlockSpec((tile_n, D), row_block),            # negatives
            ],
            out_specs=pl.BlockSpec((1, 8, 128), lambda s, t: (s, 0, 0)),
            scratch_shapes=[
                pltpu.SMEM((1, 1), jnp.float32),  # running loss sum
                pltpu.SMEM((1, 1), jnp.float32),  # running active-pair count
            ],
        ),
        compiler_params=pltpu.CompilerParams(
            dimension_semantics=("parallel", "arbitrary"),
            vmem_limit_bytes=32 * 1024 * 1024,
        ),
    )(beta_arr, anchors, positives, negatives)

    # Tiny scalar combine across shards (one add + divide) in the wrapper.
    total = jnp.sum(partials[:, 0, 0])
    pair_cnt = jnp.sum(partials[:, 0, 1])
    loss = total / (0.0001 + pair_cnt)
    return loss, pair_cnt.astype(jnp.int32)


def _margin_loss_ref(anchors, positives, negatives, beta, margin=0.2):
    a = anchors.astype(jnp.float32)
    p = positives.astype(jnp.float32)
    n = negatives.astype(jnp.float32)
    d_ap = jnp.sqrt(jnp.sum((p - a) ** 2, axis=1) + 1e-08)
    d_an = jnp.sqrt(jnp.sum((n - a) ** 2, axis=1) + 1e-08)
    pos_loss = jnp.clip(d_ap - beta + margin, 0.0)
    neg_loss = jnp.clip(beta - d_an + margin, 0.0)
    pair_cnt = jnp.sum(jnp.logical_or(pos_loss > 0.0, neg_loss > 0.0))
    loss = jnp.sum(pos_loss + neg_loss) / (0.0001 + pair_cnt)
    return loss, pair_cnt


def _check(N, D, beta, margin, max_tile_rows=4096, seed=0):
    key = jax.random.PRNGKey(seed)
    ka, kp, kn = jax.random.split(key, 3)
    anchors = jax.random.normal(ka, (N, D), jnp.float32)
    positives = anchors + 0.1 * jax.random.normal(kp, (N, D), jnp.float32)
    negatives = jax.random.normal(kn, (N, D), jnp.float32)

    loss, cnt = margin_loss(anchors, positives, negatives, beta,
                            margin=margin, max_tile_rows=max_tile_rows)
    jax.block_until_ready((loss, cnt))

    ref_loss, ref_cnt = _margin_loss_ref(anchors, positives, negatives, beta,
                                         margin=margin)
    assert int(cnt) == int(ref_cnt), (N, D, int(cnt), int(ref_cnt))
    assert jnp.allclose(loss, ref_loss, rtol=1e-5, atol=1e-6), (N, D, loss, ref_loss)


if __name__ == "__main__":
    # Small triplet batch, embedding dim (MarginLoss default margin=0.2).
    _check(N=8, D=32, beta=1.2, margin=0.2)
    # Edge-tile masking path (N not a multiple of the tile, odd tile count).
    _check(N=40, D=32, beta=1.2, margin=0.2, max_tile_rows=16, seed=1)
    # Multi-tile, 2-shard ("parallel") path.
    _check(N=64, D=32, beta=1.0, margin=0.2, max_tile_rows=16, seed=2)

    print("KERNEL_OK")
</pallas_src>

<mosaic_0001>
module attributes {stable_mosaic.version = 11 : i64} {
  func.func @_margin_loss_kernel(%arg0: i32, %arg1: i32, %arg2: memref<1x1xf32, #tpu.memory_space<smem>>, %arg3: memref<16x32xf32, #tpu.memory_space<vmem>>, %arg4: memref<16x32xf32, #tpu.memory_space<vmem>>, %arg5: memref<16x32xf32, #tpu.memory_space<vmem>>, %arg6: memref<1x8x128xf32, #tpu.memory_space<vmem>>, %arg7: memref<1x1xf32, #tpu.memory_space<smem>>, %arg8: memref<1x1xf32, #tpu.memory_space<smem>>) attributes {dimension_semantics = [#tpu.dimension_semantics<parallel>, #tpu.dimension_semantics<arbitrary>], iteration_bounds = array<i64: 1, 1>, scalar_prefetch = 0 : i64, scratch_operands = 2 : i64, tpu.core_type = #tpu.core_type<tc>, window_params = [{transform_indices = @transform_0, window_bounds = array<i64: 1, 1>}, {transform_indices = @transform_1, window_bounds = array<i64: 16, 32>}, {transform_indices = @transform_2, window_bounds = array<i64: 16, 32>}, {transform_indices = @transform_3, window_bounds = array<i64: 16, 32>}, {transform_indices = @transform_4, window_bounds = array<i64: 1, 8, 128>}]} {
    %c0_i32 = arith.constant 0 : i32
    %0 = arith.cmpi eq, %arg1, %c0_i32 : i32
    %1 = arith.extui %0 : i1 to i32
    %c0_i32_0 = arith.constant 0 : i32
    %2 = arith.cmpi ne, %1, %c0_i32_0 : i32
    scf.if %2 {
      %cst_31 = arith.constant 0.000000e+00 : f32
      %c0_32 = arith.constant 0 : index
      %c0_33 = arith.constant 0 : index
      %70 = memref.load %arg7[%c0_32, %c0_33] : memref<1x1xf32, #tpu.memory_space<smem>>
      memref.store %cst_31, %arg7[%c0_32, %c0_33] : memref<1x1xf32, #tpu.memory_space<smem>>
      %cst_34 = arith.constant 0.000000e+00 : f32
      %c0_35 = arith.constant 0 : index
      %c0_36 = arith.constant 0 : index
      %71 = memref.load %arg8[%c0_35, %c0_36] : memref<1x1xf32, #tpu.memory_space<smem>>
      memref.store %cst_34, %arg8[%c0_35, %c0_36] : memref<1x1xf32, #tpu.memory_space<smem>>
    } else {
    }
    %c0 = arith.constant 0 : index
    %c0_1 = arith.constant 0 : index
    %3 = memref.load %arg2[%c0, %c0_1] : memref<1x1xf32, #tpu.memory_space<smem>>
    %c0_2 = arith.constant 0 : index
    %c0_3 = arith.constant 0 : index
    %4 = vector.load %arg3[%c0_2, %c0_3] : memref<16x32xf32, #tpu.memory_space<vmem>>, vector<16x32xf32>
    %c0_4 = arith.constant 0 : index
    %c0_5 = arith.constant 0 : index
    %5 = vector.load %arg4[%c0_4, %c0_5] : memref<16x32xf32, #tpu.memory_space<vmem>>, vector<16x32xf32>
    %c0_6 = arith.constant 0 : index
    %c0_7 = arith.constant 0 : index
    %6 = vector.load %arg5[%c0_6, %c0_7] : memref<16x32xf32, #tpu.memory_space<vmem>>, vector<16x32xf32>
    %7 = arith.subf %5, %4 : vector<16x32xf32>
    %8 = arith.mulf %7, %7 : vector<16x32xf32>
    %cst = arith.constant dense<0.000000e+00> : vector<16xf32>
    %9 = vector.multi_reduction <add>, %8, %cst [1] : vector<16x32xf32> to vector<16xf32>
    %10 = vector.shape_cast %9 : vector<16xf32> to vector<16x1xf32>
    %cst_8 = arith.constant 9.99999993E-9 : f32
    %11 = vector.broadcast %cst_8 : f32 to vector<16x1xf32>
    %12 = arith.addf %10, %11 : vector<16x1xf32>
    %13 = math.sqrt %12 : vector<16x1xf32>
    %14 = arith.subf %6, %4 : vector<16x32xf32>
    %15 = arith.mulf %14, %14 : vector<16x32xf32>
    %cst_9 = arith.constant dense<0.000000e+00> : vector<16xf32>
    %16 = vector.multi_reduction <add>, %15, %cst_9 [1] : vector<16x32xf32> to vector<16xf32>
    %17 = vector.shape_cast %16 : vector<16xf32> to vector<16x1xf32>
    %cst_10 = arith.constant 9.99999993E-9 : f32
    %18 = vector.broadcast %cst_10 : f32 to vector<16x1xf32>
    %19 = arith.addf %17, %18 : vector<16x1xf32>
    %20 = math.sqrt %19 : vector<16x1xf32>
    %21 = vector.broadcast %3 : f32 to vector<16x1xf32>
    %22 = arith.subf %13, %21 : vector<16x1xf32>
    %cst_11 = arith.constant 2.000000e-01 : f32
    %23 = vector.broadcast %cst_11 : f32 to vector<16x1xf32>
    %24 = arith.addf %22, %23 : vector<16x1xf32>
    %cst_12 = arith.constant 0.000000e+00 : f32
    %25 = vector.broadcast %cst_12 : f32 to vector<16x1xf32>
    %26 = arith.maximumf %24, %25 : vector<16x1xf32>
    %27 = vector.broadcast %3 : f32 to vector<16x1xf32>
    %28 = arith.subf %27, %20 : vector<16x1xf32>
    %cst_13 = arith.constant 2.000000e-01 : f32
    %29 = vector.broadcast %cst_13 : f32 to vector<16x1xf32>
    %30 = arith.addf %28, %29 : vector<16x1xf32>
    %cst_14 = arith.constant 0.000000e+00 : f32
    %31 = vector.broadcast %cst_14 : f32 to vector<16x1xf32>
    %32 = arith.maximumf %30, %31 : vector<16x1xf32>
    %33 = arith.addf %26, %32 : vector<16x1xf32>
    %cst_15 = arith.constant 0.000000e+00 : f32
    %34 = vector.broadcast %cst_15 : f32 to vector<16x1xf32>
    %35 = arith.cmpf ogt, %26, %34 : vector<16x1xf32>
    %cst_16 = arith.constant 0.000000e+00 : f32
    %36 = vector.broadcast %cst_16 : f32 to vector<16x1xf32>
    %37 = arith.cmpf ogt, %32, %36 : vector<16x1xf32>
    %38 = arith.ori %35, %37 : vector<16x1xi1>
    %39 = arith.extui %38 : vector<16x1xi1> to vector<16x1xi32>
    %40 = arith.sitofp %39 : vector<16x1xi32> to vector<16x1xf32>
    %c1_i32 = arith.constant 1 : i32
    %41 = arith.muli %arg0, %c1_i32 : i32
    %42 = arith.addi %41, %arg1 : i32
    %c16_i32 = arith.constant 16 : i32
    %43 = arith.muli %42, %c16_i32 : i32
    %44 = tpu.iota {dimensions = array<i32: 0>} : vector<16x1xi32>
    %45 = vector.broadcast %43 : i32 to vector<16x1xi32>
    %46 = arith.addi %45, %44 : vector<16x1xi32>
    %c8_i32 = arith.constant 8 : i32
    %47 = vector.broadcast %c8_i32 : i32 to vector<16x1xi32>
    %48 = arith.cmpi slt, %46, %47 : vector<16x1xi32>
    %cst_17 = arith.constant 0.000000e+00 : f32
    %49 = vector.broadcast %cst_17 : f32 to vector<16x1xf32>
    %50 = arith.select %48, %33, %49 : vector<16x1xi1>, vector<16x1xf32>
    %cst_18 = arith.constant 0.000000e+00 : f32
    %51 = vector.broadcast %cst_18 : f32 to vector<16x1xf32>
    %52 = arith.select %48, %40, %51 : vector<16x1xi1>, vector<16x1xf32>
    %c0_19 = arith.constant 0 : index
    %c0_20 = arith.constant 0 : index
    %53 = memref.load %arg7[%c0_19, %c0_20] : memref<1x1xf32, #tpu.memory_space<smem>>
    %54 = vector.shape_cast %50 : vector<16x1xf32> to vector<1x16x1xf32>
    %cst_21 = arith.constant dense<0.000000e+00> : vector<1xf32>
    %55 = vector.multi_reduction <add>, %54, %cst_21 [1, 2] : vector<1x16x1xf32> to vector<1xf32>
    %56 = vector.shape_cast %55 : vector<1xf32> to vector<1x1x1xf32>
    %57 = vector.extract %56[0, 0, 0] : f32 from vector<1x1x1xf32>
    %58 = arith.addf %53, %57 : f32
    %c0_22 = arith.constant 0 : index
    %c0_23 = arith.constant 0 : index
    %59 = memref.load %arg7[%c0_22, %c0_23] : memref<1x1xf32, #tpu.memory_space<smem>>
    memref.store %58, %arg7[%c0_22, %c0_23] : memref<1x1xf32, #tpu.memory_space<smem>>
    %c0_24 = arith.constant 0 : index
    %c0_25 = arith.constant 0 : index
    %60 = memref.load %arg8[%c0_24, %c0_25] : memref<1x1xf32, #tpu.memory_space<smem>>
    %61 = vector.shape_cast %52 : vector<16x1xf32> to vector<1x16x1xf32>
    %cst_26 = arith.constant dense<0.000000e+00> : vector<1xf32>
    %62 = vector.multi_reduction <add>, %61, %cst_26 [1, 2] : vector<1x16x1xf32> to vector<1xf32>
    %63 = vector.shape_cast %62 : vector<1xf32> to vector<1x1x1xf32>
    %64 = vector.extract %63[0, 0, 0] : f32 from vector<1x1x1xf32>
    %65 = arith.addf %60, %64 : f32
    %c0_27 = arith.constant 0 : index
    %c0_28 = arith.constant 0 : index
    %66 = memref.load %arg8[%c0_27, %c0_28] : memref<1x1xf32, #tpu.memory_space<smem>>
    memref.store %65, %arg8[%c0_27, %c0_28] : memref<1x1xf32, #tpu.memory_space<smem>>
    %c0_i32_29 = arith.constant 0 : i32
    %67 = arith.cmpi eq, %arg1, %c0_i32_29 : i32
    %68 = arith.extui %67 : i1 to i32
    %c0_i32_30 = arith.constant 0 : i32
    %69 = arith.cmpi ne, %68, %c0_i32_30 : i32
    scf.if %69 {
      %70 = tpu.iota {dimensions = array<i32: 1>} : vector<1x8x128xi32>
      %71 = tpu.iota {dimensions = array<i32: 2>} : vector<1x8x128xi32>
      %c0_i32_31 = arith.constant 0 : i32
      %72 = vector.broadcast %c0_i32_31 : i32 to vector<1x8x128xi32>
      %73 = arith.cmpi eq, %70, %72 : vector<1x8x128xi32>
      %c0_i32_32 = arith.constant 0 : i32
      %74 = vector.broadcast %c0_i32_32 : i32 to vector<1x8x128xi32>
      %75 = arith.cmpi eq, %71, %74 : vector<1x8x128xi32>
      %76 = arith.andi %73, %75 : vector<1x8x128xi1>
      %c0_33 = arith.constant 0 : index
      %c0_34 = arith.constant 0 : index
      %77 = memref.load %arg7[%c0_33, %c0_34] : memref<1x1xf32, #tpu.memory_space<smem>>
      %c0_i32_35 = arith.constant 0 : i32
      %78 = vector.broadcast %c0_i32_35 : i32 to vector<1x8x128xi32>
      %79 = arith.cmpi eq, %70, %78 : vector<1x8x128xi32>
      %c1_i32_36 = arith.constant 1 : i32
      %80 = vector.broadcast %c1_i32_36 : i32 to vector<1x8x128xi32>
      %81 = arith.cmpi eq, %71, %80 : vector<1x8x128xi32>
      %82 = arith.andi %79, %81 : vector<1x8x128xi1>
      %c0_37 = arith.constant 0 : index
      %c0_38 = arith.constant 0 : index
      %83 = memref.load %arg8[%c0_37, %c0_38] : memref<1x1xf32, #tpu.memory_space<smem>>
      %cst_39 = arith.constant 0.000000e+00 : f32
      %84 = vector.broadcast %83 : f32 to vector<1x8x128xf32>
      %85 = vector.broadcast %cst_39 : f32 to vector<1x8x128xf32>
      %86 = arith.select %82, %84, %85 : vector<1x8x128xi1>, vector<1x8x128xf32>
      %87 = vector.broadcast %77 : f32 to vector<1x8x128xf32>
      %88 = arith.select %76, %87, %86 : vector<1x8x128xi1>, vector<1x8x128xf32>
      %c0_40 = arith.constant 0 : index
      %c0_41 = arith.constant 0 : index
      %c0_42 = arith.constant 0 : index
      %89 = vector.load %arg6[%c0_40, %c0_41, %c0_42] : memref<1x8x128xf32, #tpu.memory_space<vmem>>, vector<1x8x128xf32>
      tpu.vector_store %arg6[%c0_40, %c0_41, %c0_42], %88 {strides = array<i32>} : memref<1x8x128xf32, #tpu.memory_space<vmem>>, vector<1x8x128xf32>,
    } else {
    }
    return
  }
  func.func @transform_0(%arg0: i32, %arg1: i32) -> (i32, i32) {
    %c0_i32 = arith.constant 0 : i32
    %c0_i32_0 = arith.constant 0 : i32
    %c0_i32_1 = arith.constant 0 : i32
    return %c0_i32, %c0_i32_0 : i32, i32
  }
  func.func @transform_1(%arg0: i32, %arg1: i32) -> (i32, i32) {
    %c1_i32 = arith.constant 1 : i32
    %0 = arith.muli %arg0, %c1_i32 : i32
    %1 = arith.addi %0, %arg1 : i32
    %c0_i32 = arith.constant 0 : i32
    %c0_i32_0 = arith.constant 0 : i32
    return %1, %c0_i32 : i32, i32
  }
  func.func @transform_2(%arg0: i32, %arg1: i32) -> (i32, i32) {
    %c1_i32 = arith.constant 1 : i32
    %0 = arith.muli %arg0, %c1_i32 : i32
    %1 = arith.addi %0, %arg1 : i32
    %c0_i32 = arith.constant 0 : i32
    %c0_i32_0 = arith.constant 0 : i32
    return %1, %c0_i32 : i32, i32
  }
  func.func @transform_3(%arg0: i32, %arg1: i32) -> (i32, i32) {
    %c1_i32 = arith.constant 1 : i32
    %0 = arith.muli %arg0, %c1_i32 : i32
    %1 = arith.addi %0, %arg1 : i32
    %c0_i32 = arith.constant 0 : i32
    %c0_i32_0 = arith.constant 0 : i32
    return %1, %c0_i32 : i32, i32
  }
  func.func @transform_4(%arg0: i32, %arg1: i32) -> (i32, i32, i32) {
    %c0_i32 = arith.constant 0 : i32
    %c0_i32_0 = arith.constant 0 : i32
    %c0_i32_1 = arith.constant 0 : i32
    return %arg0, %c0_i32, %c0_i32_0 : i32, i32, i32
  }
}

</mosaic_0001>

<bundles_post_ra>
// kernel: tpu_custom_call.1
= control target key start
LH: loop header
LB: loop body
LE: loop exit
PB: predicated region body
PF: predicated region fallthrough
CT: control target
= control target key end

     0   :  { %10 = vsyncpa [#allocation6], 0  ;;  %s443_s0 = inlined_call_operand.<no memory space> [shape: f32[1,1], index: 0, kind: input, shape index: {}]   ;;  %s444_s1 = inlined_call_operand.hbm [shape: f32[8,32], index: 1, kind: input, shape index: {}]   ;;  %s445_s2 = inlined_call_operand.hbm [shape: f32[8,32], index: 2, kind: input, shape index: {}]   ;;  %s446_s3 = inlined_call_operand.vmem [shape: f32[8,32], index: 3, kind: input, shape index: {}]   ;;  %s447_s4 = inlined_call_operand.hbm [shape: f32[1,8,128], index: 4, kind: output, shape index: {}]  }
   0x1   :  { %11 = vsyncpa [#allocation9], 0 }
   0x2   :  { %12 = vsyncpa [#allocation7], 0 }
   0x3   :  { %23 = vsyncadd [#allocation6], 128  ;;  %s370_s15 = smov [#allocation5]   ;;  %s298_s19 = scalar_lea.hbm %s444_s1, 128 }
   0x4   :  { %s28_s16 = sshll.u32 %s370_s15, 4  ;;  %p299_p0 = scmp.ne.s32.totalorder %s444_s1, %s298_s19  ;;  %s29_s16 = int_to_ptr.vmem [resolvable:$true] %s28_s16 }
   0x5   :  { %p302_p1 = scmp.lt.u32.totalorder %s298_s19, %s444_s1 }
   0x7   :  { %p304_p2 = pnand %p302_p1, %p299_p0 }
   0x9   :  { %307 = shalt.err (!%p304_p2)
}
   0xa   :  { %s308_s24 = scalar_lea.vmem %s29_s16, 128  ;;  %s312_s25 = scalar_lea.vmem %s29_s16, 256 }
   0xb   :  { %p309_p3 = scmp.ne.s32.totalorder %s29_s16, %s308_s24  ;;  %p313_p4 = scmp.lt.s32.totalorder %s29_s16, %s29_s16 }
   0xc   :  { %p314_p5 = scmp.lt.s32.totalorder %s312_s25, %s308_s24 }
   0xe   :  { %p315_p6 = por %p314_p5, %p313_p4 }
  0x10   :  { %p316_p7 = pnand %p315_p6, %p309_p3 }
  0x12   :  { %319 = shalt.err (!%p316_p7)
}
  0x13   :  { %s371_s26 = smov 128   ;;  %s372_s27 = smov 8  }
  0x14   :  { %34 = dma.hbm_to_vmem [thread:$0]  %s444_s1, 128, %s29_s16, [#allocation6], %s371_s26, %s371_s26, %s372_s27  }
  0x15   :  { %43 = vsyncadd [#allocation9], 128  ;;  %s373_s30 = smov [#allocation8]   ;;  %s320_s8 = scalar_lea.hbm %s445_s2, 128 }
  0x16   :  { %s48_s5 = sshll.u32 %s373_s30, 4  ;;  %p321_p8 = scmp.ne.s32.totalorder %s445_s2, %s320_s8  ;;  %s49_s5 = int_to_ptr.vmem [resolvable:$true] %s48_s5 }
  0x17   :  { %p324_p9 = scmp.lt.u32.totalorder %s320_s8, %s445_s2 }
  0x19   :  { %p326_p10 = pnand %p324_p9, %p321_p8 }
  0x1b   :  { %329 = shalt.err (!%p326_p10)
}
  0x1c   :  { %s330_s13 = scalar_lea.vmem %s49_s5, 128  ;;  %s334_s1 = scalar_lea.vmem %s49_s5, 256 }
  0x1d   :  { %p331_p11 = scmp.ne.s32.totalorder %s49_s5, %s330_s13  ;;  %p335_p12 = scmp.lt.s32.totalorder %s49_s5, %s49_s5 }
  0x1e   :  { %p336_p13 = scmp.lt.s32.totalorder %s334_s1, %s330_s13 }
  0x20   :  { %p337_p0 = por %p336_p13, %p335_p12 }
  0x22   :  { %p338_p1 = pnand %p337_p0, %p331_p11 }
  0x24   :  { %341 = shalt.err (!%p338_p1)
}
  0x25   :  { %54 = dma.hbm_to_vmem [thread:$0]  %s445_s2, 128, %s49_s5, [#allocation9], %s371_s26, %s371_s26, %s372_s27  }
  0x26   :  { %364 = dma.done.wait [#allocation6], 256  }
  0x27   :  { %365 = vsyncadd [#allocation6], 4294967040 }
  0x28   :  { %366 = dma.done.wait [#allocation9], 256  }
  0x29   :  { %367 = vsyncadd [#allocation9], 4294967040  ;;  %v112_v0 = vld [vmem:[#allocation5] sm:$0xff]  ;;  %v114_v1 = vld [vmem:[#allocation8] sm:$0xff]  ;;  %vm122_vm0 = vcmask 261120   ;;  %v171_v16 = vstv %s443_s0  ;;  %vm211_vm5 = vcmask 7168   ;;  %v198_v49 = vlaneseq }
  0x2a   :  { %v116_v2 = vld [vmem:[%s446_s3] sm:$0xff]  ;;  %v118_v3 = vsub.f32 %v114_v1, %v112_v0  ;;  %v374_v32 = vmov 0.0   ;;  %s375_s18 = smov [#allocation10]  }
  0x2b   :  { %v145_v4 = vsub.f32 %v116_v2, %v112_v0  ;;  %v199_v50 = vshrl.u32 %v198_v49, 7  ;;  %v247_v51 = vand.u32 127, %v198_v49  ;;  %s266_s19 = sshll.u32 %s375_s18, 4  ;;  %s267_s19 = int_to_ptr.vmem [resolvable:$true] %s266_s19 }
  0x2c   :  { %v120_v5 = vmul.f32 %v118_v3, %v118_v3  ;;  %s342_s21 = scalar_lea.vmem %s267_s19, 128  ;;  %p347_p3 = scmp.lt.s32.totalorder %s267_s19, %s267_s19 }
  0x2d   :  { %v147_v6 = vmul.f32 %v145_v4, %v145_v4  ;;  %vm248_vm9 = vcmp.eq.s32.totalorder %v199_v50, 0  ;;  %vm252_vm10 = vcmp.eq.s32.totalorder %v247_v51, 1  ;;  %vm249_vm11 = vcmp.eq.s32.totalorder %v247_v51, 0  ;;  %p343_p2 = scmp.ne.s32.totalorder %s267_s19, %s342_s21  ;;  %p348_p4 = scmp.lt.s32.totalorder %s342_s21, %s342_s21 }
  0x2e   :  { %v123_v7 = vsel %vm122_vm0, %v120_v5, 0.0  ;;  %vm253_vm12 = vmand %vm248_vm9, %vm252_vm10 }
  0x2f   :  { %124 = vadd.xlane.f32.xlu0 %v123_v7  ;;  %v149_v8 = vsel %vm122_vm0, %v147_v6, 0.0  ;;  %vm250_vm13 = vmand %vm248_vm9, %vm249_vm11  ;;  %p349_p5 = por %p348_p4, %p347_p3 }
  0x31   :  { %p350_p6 = pnand %p349_p5, %p343_p2 }
  0x33   :  { %150 = vadd.xlane.f32.xlu0 %v149_v8 }
  0xbc   :  { %v125_v9 = vpop.xlane.xlu0 %124 }
  0xbd   :  { %v129_v10 = vadd.f32 1e-08, %v125_v9 }
  0xbf   :  { %294 = vrsqrt.f32 %v129_v10  ;;  %vm133_vm1 = vcmp.eq.f32.partialorder %v129_v10, inf  ;;  %v136_v15 = vand.u32 2147483648, %v129_v10  ;;  %vm135_vm2 = vcmp.eq.f32.partialorder %v129_v10, 0.0 }
  0xc0   :  { %v151_v11 = vpop.xlane.xlu0 %150 }
  0xc1   :  { %v155_v12 = vadd.f32 1e-08, %v151_v11 }
  0xc3   :  { %296 = vrsqrt.f32 %v155_v12  ;;  %vm159_vm3 = vcmp.eq.f32.partialorder %v155_v12, inf  ;;  %v162_v22 = vand.u32 2147483648, %v155_v12  ;;  %vm161_vm4 = vcmp.eq.f32.partialorder %v155_v12, 0.0 }
  0xc9   :  { %v295_v13 = vpop.eup %294 }
  0xca   :  { %v132_v14 = vmul.f32 %v295_v13, %v129_v10 }
  0xcc   :  { %v134_v17 = vsel %vm133_vm1, %v129_v10, %v132_v14 }
  0xcd   :  { %v297_v18 = vpop.eup %296  ;;  %v137_v19 = vsel %vm135_vm2, %v136_v15, %v134_v17 }
  0xce   :  { %v158_v20 = vmul.f32 %v297_v18, %v155_v12  ;;  %v172_v21 = vsub.f32 %v137_v19, %v171_v16 }
  0xd0   :  { %v160_v23 = vsel %vm159_vm3, %v155_v12, %v158_v20  ;;  %v174_v24 = vadd.f32 0.2, %v172_v21 }
  0xd1   :  { %v163_v25 = vsel %vm161_vm4, %v162_v22, %v160_v23 }
  0xd2   :  { %v178_v26 = vsub.f32 %v171_v16, %v163_v25  ;;  %v176_v27 = vmax.f32 %v174_v24, 0.0 }
  0xd4   :  { %v180_v28 = vadd.f32 0.2, %v178_v26  ;;  %vm186_vm6 = vcmp.gt.f32.partialorder %v176_v27, 0.0 }
  0xd6   :  { %v182_v29 = vmax.f32 %v180_v28, 0.0 }
  0xd8   :  { %v184_v30 = vadd.f32 %v182_v29, %v176_v27  ;;  %vm188_vm7 = vcmp.gt.f32.partialorder %v182_v29, 0.0 }
  0xd9   :  { %vm190_vm8 = vmor %vm186_vm6, %vm188_vm7 }
  0xda   :  { %v212_v31 = vsel %vm211_vm5, %v184_v30, 0.0  ;;  %v282_v33 = vsel %vm190_vm8, 1.0, %v374_v32 }
  0xdb   :  { %215 = vadd.xlane.f32.xlu1 %v212_v31  ;;  %v228_v34 = vsel %vm211_vm5, %v282_v33, 0.0 }
  0xdf   :  { %231 = vadd.xlane.f32.xlu1 %v228_v34 }
 0x168   :  { %v216_v35 = vpop.xlane.xlu1 %215 }
 0x169   :  { %v217_v36 = vrot.slane %v216_v35, 4 }
 0x16b   :  { %v218_v37 = vadd.f32 %v217_v36, %v216_v35 }
 0x16c   :  { %v232_v38 = vpop.xlane.xlu1 %231 }
 0x16d   :  { %v219_v39 = vrot.slane %v218_v37, 2  ;;  %v233_v40 = vrot.slane %v232_v38, 4 }
 0x16f   :  { %v234_v41 = vadd.f32 %v233_v40, %v232_v38  ;;  %v220_v42 = vadd.f32 %v219_v39, %v218_v37 }
 0x171   :  { %v235_v43 = vrot.slane %v234_v41, 2  ;;  %v221_v44 = vrot.slane %v220_v42, 1 }
 0x173   :  { %v236_v45 = vadd.f32 %v235_v43, %v234_v41  ;;  %v222_v46 = vadd.f32 %v221_v44, %v220_v42 }
 0x175   :  { %284 = vpush %v222_v46  ;;  %v237_v47 = vrot.slane %v236_v45, 1 }
 0x177   :  { %v238_v48 = vadd.f32 %v237_v47, %v236_v45 }
 0x179   :  { %286 = vpush %v238_v48 }
 0x1a6   :  { %s285_s0 = spop %284 }
 0x1a7   :  { %v257_v53 = vstv %s285_s0 }
 0x1aa   :  { %s287_s20 = spop %286 }
 0x1ab   :  { %v255_v52 = vstv %s287_s20 }
 0x1ac   :  { %v256_v54 = vsel %vm253_vm12, %v255_v52, 0.0 }
 0x1ad   :  { %v258_v55 = vsel %vm250_vm13, %v257_v53, %v256_v54 }
 0x1ae   :  { %259 = vst [vmem:[#allocation10] sm:$0xff] %v258_v55 }
 0x1af   :  { %353 = shalt.err (!%p350_p6)
}
 0x1b0   :  { %s354_s24 = scalar_lea.hbm %s447_s4, 128 }
 0x1b1   :  { %p355_p7 = scmp.ne.s32.totalorder %s447_s4, %s354_s24  ;;  %p358_p8 = scmp.lt.u32.totalorder %s354_s24, %s447_s4 }
 0x1b3   :  { %p360_p9 = pnand %p358_p8, %p355_p7 }
 0x1b5   :  { %363 = shalt.err (!%p360_p9)
}
 0x1b6   :  { %269 = dma.vmem_to_hbm [thread:$0]  %s267_s19, 128, %s447_s4, [#allocation7]  }
 0x1b7   :  { %368 = dma.done.wait [#allocation7], 128  }
 0x1b8   :  { %369 = vsyncadd [#allocation7], 4294967168 }
 0x1b9   :  { %273 = vsyncpa [#allocation6], 1 }
 0x1ba   :  { %274 = vsyncpa [#allocation9], 1 }
 0x1bb   :  { %275 = vsyncpa [#allocation7], 1 }

</bundles_post_ra>
